<compile_context>
chip_gen: v6e
topology: v6e:2x2x1
jax: 0.10.0
libtpu: 0.0.40
codegen_flags: <defaults>
</compile_context>

<pallas_src>
import functools
import re

import jax
import jax.numpy as jnp
from jax.experimental import pallas as pl
from jax.experimental.pallas import tpu as pltpu


# Below this many elements, plain XLA (fused with neighbours) beats the
# pallas_call custom-call + per-grid-step overhead.
_MIN_PALLAS_ELEMENTS = 1 << 18  # 262144

_LANE_CANDIDATES = (4096, 2048, 1024, 512, 256, 128)


def _chip_generation():
    """Best-effort TPU generation (e.g. 5, 6, 7) or None if unknown."""
    # Preferred: structured hardware query.
    try:
        info = pltpu.get_tpu_info()
        for attr in ("chip_version", "version", "generation"):
            val = getattr(info, attr, None)
            if val is not None:
                m = re.search(r"(\d+)", str(val))
                if m:
                    return int(m.group(1))
    except Exception:
        pass
    # Fallback: parse device_kind ("TPU v5e", "TPU v6 lite", "TPU7x", ...).
    try:
        kind = jax.devices()[0].device_kind
    except Exception:
        return None
    m = re.search(r"v?(\d+)", kind)
    return int(m.group(1)) if m else None


def _device_config():
    """Per-generation tile-size / VMEM-limit / TC-count / bf16 settings."""
    gen = _chip_generation()
    if gen is not None and gen >= 7:
        # v7x: 3.2 TB/s HBM, 64 MiB physical VMEM, 2 TCs/chip, bf16 VPU/EUP.
        return dict(block_bytes=4 << 20, vmem_limit=32 << 20, num_tc=2,
                    bf16_native=True)
    if gen == 6:
        # v6e: 1.4 TB/s HBM, 128 MiB physical VMEM, 1 TC, bf16 VPU/EUP.
        return dict(block_bytes=8 << 20, vmem_limit=64 << 20, num_tc=1,
                    bf16_native=True)
    # v5e and older / unknown: conservative tiles, explicit (but modest) limit;
    # v5e's scoped-VMEM default is only 16 MiB.
    return dict(block_bytes=1 << 20, vmem_limit=32 << 20, num_tc=1,
                bf16_native=False)


def _pick_lane_w(n):
    """Largest lane width from the candidate list that divides n exactly."""
    for w in _LANE_CANDIDATES:
        if n % w == 0:
            return w
    return None


def _sigmoid_kernel(x_ref, o_ref, *, compute_dtype):
    # Numerically stable sigmoid:
    #   z = exp(-|x|);  sigmoid(x) = where(x >= 0, 1, z) / (1 + z)
    # One EUP transcendental per vreg; the VPU divide is hidden under DMA in
    # this HBM-bandwidth-bound kernel.
    x = x_ref[...].astype(compute_dtype)
    one = jnp.asarray(1, compute_dtype)
    z = jnp.exp(-jnp.abs(x))
    num = jnp.where(x >= 0, one, z)
    o_ref[...] = (num / (one + z)).astype(o_ref.dtype)


def baseline2_forward(pred, *, force_pallas=False, donate_input=False):
    """Pallas implementation of Baseline2.forward: sigmoid(pred)."""
    n = pred.size
    orig_shape = pred.shape
    orig_dtype = pred.dtype

    lane_w = _pick_lane_w(n) if n > 0 else None
    use_pallas = lane_w is not None and (n >= _MIN_PALLAS_ELEMENTS or force_pallas)
    if not use_pallas:
        # Tiny or ragged (n % 128 != 0): a standalone elementwise sigmoid under
        # plain XLA is already at HBM roofline and fuses with producers /
        # consumers; Pallas would only add pad/slice passes and call overhead.
        return jax.nn.sigmoid(pred)

    cfg = _device_config()

    # Compute dtype: bf16-native on v6e/v7x (bf16 VPU/EUP), f32 elsewhere.
    if orig_dtype == jnp.bfloat16 and cfg["bf16_native"]:
        compute_dtype = jnp.bfloat16
    else:
        compute_dtype = jnp.float32

    # ---- lane-dense 2D slab layout (pure reshape, no pad/copy) -----------
    rows = n // lane_w
    itemsize = jnp.dtype(orig_dtype).itemsize
    # bf16 packs two rows per sublane -> 16-row alignment avoids repack ops.
    row_align = 16 if orig_dtype == jnp.bfloat16 else 8

    # Target tile height from the per-chip byte budget.
    target_rows = cfg["block_bytes"] // (lane_w * itemsize)
    target_rows = max(row_align, (target_rows // row_align) * row_align)

    # On multi-TC chips (v7x) make sure the "parallel" grid has enough steps
    # to shard across both TensorCores.
    if cfg["num_tc"] >= 2 and rows >= cfg["num_tc"] * row_align:
        cap = max(row_align, (rows // cfg["num_tc"]) // row_align * row_align)
        target_rows = min(target_rows, cap)

    if rows <= target_rows:
        # Single full-height block; the full-array-dim exception covers rows
        # that are not a multiple of the sublane alignment.
        block_rows = rows
    else:
        block_rows = target_rows  # aligned; last grid step may be partial
    grid = (pl.cdiv(rows, block_rows),)

    x2d = pred.reshape(rows, lane_w)  # free: no padding, no data movement

    kernel = functools.partial(_sigmoid_kernel, compute_dtype=compute_dtype)

    cost = pl.CostEstimate(
        flops=4 * n,            # abs + select + add + div per element
        transcendentals=n,      # one exp per element
        bytes_accessed=2 * n * itemsize,
    )

    call_kwargs = {}
    if donate_input:
        # Reuse pred's HBM buffer for the output (caller must donate pred).
        call_kwargs["input_output_aliases"] = {0: 0}

    out2d = pl.pallas_call(
        kernel,
        out_shape=jax.ShapeDtypeStruct((rows, lane_w), orig_dtype),
        grid_spec=pltpu.PrefetchScalarGridSpec(
            num_scalar_prefetch=0,
            grid=grid,
            in_specs=[pl.BlockSpec((block_rows, lane_w), lambda i: (i, 0))],
            out_specs=pl.BlockSpec((block_rows, lane_w), lambda i: (i, 0)),
        ),
        compiler_params=pltpu.CompilerParams(
            dimension_semantics=("parallel",),
            vmem_limit_bytes=cfg["vmem_limit"],
        ),
        cost_estimate=cost,
        **call_kwargs,
    )(x2d)

    return out2d.reshape(orig_shape)


def init_baseline2_params(input_dim, key):
    """Deterministic init of the (unused-in-forward) fc Linear layer,
    mirroring torch.nn.Linear(input_dim, input_dim)."""
    kw, kb = jax.random.split(key)
    bound = 1.0 / jnp.sqrt(input_dim)
    w = jax.random.uniform(kw, (input_dim, input_dim), jnp.float32, -bound, bound)
    b = jax.random.uniform(kb, (input_dim,), jnp.float32, -bound, bound)
    return {"fc_w": w, "fc_b": b}
    # TODO(synk): self.fc and self.loss (BCELoss) are never used in forward();
    # parameters are initialized for shape parity only.


if __name__ == "__main__":
    key = jax.random.PRNGKey(0)
    k_small, k_params, k_med = jax.random.split(key, 3)

    # Module-scale demo shape (tiny): routes through the jax.nn.sigmoid fast
    # path by design (see _MIN_PALLAS_ELEMENTS).
    batch, input_dim = 8, 32
    pred_small = jax.random.normal(k_small, (batch, input_dim), dtype=jnp.float32)
    _params = init_baseline2_params(input_dim, k_params)  # unused in forward

    ref_small = jax.nn.sigmoid(pred_small)
    out_small = jax.block_until_ready(baseline2_forward(pred_small))
    assert out_small.shape == (batch, input_dim)
    assert jnp.allclose(out_small, ref_small, atol=1e-6), "small-input mismatch"

    # Force the Pallas kernel on the same tiny input: exercises the pad-free
    # lane-dense reshape path and the full-dim block exception end to end.
    out_forced = jax.block_until_ready(
        baseline2_forward(pred_small, force_pallas=True))
    assert jnp.allclose(out_forced, ref_small, atol=1e-6), "forced-Pallas mismatch"

    # Medium input: crosses _MIN_PALLAS_ELEMENTS, divides evenly into a
    # 4096-lane slab (no padding), multi-row tiles, and on v7x a >=2-step
    # 'parallel' grid so both TensorCores get work.
    pred_med = jax.random.normal(k_med, (512, 512), dtype=jnp.float32)
    out_med = jax.block_until_ready(baseline2_forward(pred_med))
    assert jnp.allclose(out_med, jax.nn.sigmoid(pred_med), atol=1e-6), \
        "medium-input mismatch"

    # bf16 path: native bf16 compute on v6e/v7x, f32 compute elsewhere.
    pred_bf16 = pred_med.astype(jnp.bfloat16)
    out_bf16 = jax.block_until_ready(baseline2_forward(pred_bf16))
    ref_bf16 = jax.nn.sigmoid(pred_bf16.astype(jnp.float32))
    assert jnp.allclose(out_bf16.astype(jnp.float32), ref_bf16, atol=2e-2), \
        "bf16 mismatch"

    print("KERNEL_OK")
</pallas_src>

<mosaic_0001>
module attributes {stable_mosaic.version = 11 : i64} {
  func.func @_sigmoid_kernel(%arg0: i32, %arg1: memref<1x256xf32, #tpu.memory_space<vmem>>, %arg2: memref<1x256xf32, #tpu.memory_space<vmem>>) attributes {dimension_semantics = [#tpu.dimension_semantics<parallel>], iteration_bounds = array<i64: 1>, scalar_prefetch = 0 : i64, scratch_operands = 0 : i64, tpu.core_type = #tpu.core_type<tc>, window_params = [{transform_indices = @transform_0, window_bounds = array<i64: 1, 256>}, {transform_indices = @transform_1, window_bounds = array<i64: 1, 256>}]} {
    %c0 = arith.constant 0 : index
    %c0_0 = arith.constant 0 : index
    %0 = vector.load %arg1[%c0, %c0_0] : memref<1x256xf32, #tpu.memory_space<vmem>>, vector<1x256xf32>
    %1 = math.absf %0 : vector<1x256xf32>
    %cst = arith.constant 0.000000e+00 : f32
    %2 = vector.broadcast %cst : f32 to vector<1x256xf32>
    %3 = arith.subf %2, %1 : vector<1x256xf32>
    %4 = math.exp %3 : vector<1x256xf32>
    %cst_1 = arith.constant 0.000000e+00 : f32
    %5 = vector.broadcast %cst_1 : f32 to vector<1x256xf32>
    %6 = arith.cmpf oge, %0, %5 : vector<1x256xf32>
    %cst_2 = arith.constant 1.000000e+00 : f32
    %7 = vector.broadcast %cst_2 : f32 to vector<1x256xf32>
    %8 = arith.select %6, %7, %4 : vector<1x256xi1>, vector<1x256xf32>
    %cst_3 = arith.constant 1.000000e+00 : f32
    %9 = vector.broadcast %cst_3 : f32 to vector<1x256xf32>
    %10 = arith.addf %9, %4 : vector<1x256xf32>
    %11 = arith.divf %8, %10 : vector<1x256xf32>
    %c0_4 = arith.constant 0 : index
    %c0_5 = arith.constant 0 : index
    %12 = vector.load %arg2[%c0_4, %c0_5] : memref<1x256xf32, #tpu.memory_space<vmem>>, vector<1x256xf32>
    tpu.vector_store %arg2[%c0_4, %c0_5], %11 {strides = array<i32>} : memref<1x256xf32, #tpu.memory_space<vmem>>, vector<1x256xf32>,
    return
  }
  func.func @transform_0(%arg0: i32) -> (i32, i32) {
    %c0_i32 = arith.constant 0 : i32
    %c0_i32_0 = arith.constant 0 : i32
    return %arg0, %c0_i32 : i32, i32
  }
  func.func @transform_1(%arg0: i32) -> (i32, i32) {
    %c0_i32 = arith.constant 0 : i32
    %c0_i32_0 = arith.constant 0 : i32
    return %arg0, %c0_i32 : i32, i32
  }
}

</mosaic_0001>

<bundles_post_ra>
// kernel: tpu_custom_call.1
= control target key start
LH: loop header
LB: loop body
LE: loop exit
PB: predicated region body
PF: predicated region fallthrough
CT: control target
= control target key end

     0   :  { %6 = vsyncpa [#allocation3], 0  ;;  %s119_s0 = inlined_call_operand.hbm [shape: f32[1,256], index: 0, kind: input, shape index: {}]   ;;  %s120_s1 = inlined_call_operand.hbm [shape: f32[1,256], index: 1, kind: output, shape index: {}]  }
   0x1   :  { %7 = vsyncpa [#allocation4], 0  ;;  %s101_s6 = smov [#allocation2]  }
   0x2   :  { %s14_s7 = sshll.u32 %s101_s6, 4  ;;  %s15_s7 = int_to_ptr.vmem [resolvable:$true] %s14_s7 }
   0x3   :  { %s65_s8 = scalar_lea.vmem %s15_s7, 32  ;;  %p70_p1 = scmp.lt.s32.totalorder %s15_s7, %s15_s7 }
   0x4   :  { %p66_p0 = scmp.ne.s32.totalorder %s15_s7, %s65_s8  ;;  %p71_p2 = scmp.lt.s32.totalorder %s65_s8, %s65_s8 }
   0x6   :  { %p72_p3 = por %p71_p2, %p70_p1 }
   0x8   :  { %p73_p4 = pnand %p72_p3, %p66_p0 }
   0xa   :  { %76 = shalt.err (!%p73_p4)
}
   0xb   :  { %17 = dma.hbm_to_vmem [thread:$0]  %s119_s0, 32, %s15_s7, [#allocation3]  }
   0xc   :  { %97 = dma.done.wait [#allocation3], 32  }
   0xd   :  { %98 = vsyncadd [#allocation3], 4294967264  ;;  %v21_v0 = vld [vmem:[#allocation2] sm:$0x3]  ;;  %v31_v6 = vlaneseq  ;;  %s102_s11 = smov [#allocation5]  }
   0xe   :  { %v22_v1 = vand.u32 2147483647, %v21_v0  ;;  %vm26_vm0 = vcmp.ge.f32.partialorder %v21_v0, 0.0  ;;  %s42_s12 = sshll.u32 %s102_s11, 4  ;;  %s43_s12 = int_to_ptr.vmem [resolvable:$true] %s42_s12 }
   0xf   :  { %vm33_vm1 = vcmp.lt.s32.totalorder %v31_v6, 256  ;;  %s77_s0 = scalar_lea.vmem %s43_s12, 32  ;;  %p82_p6 = scmp.lt.s32.totalorder %s43_s12, %s43_s12 }
  0x10   :  { %v23_v2 = vsub.f32 0.0, %v22_v1  ;;  %p78_p5 = scmp.ne.s32.totalorder %s43_s12, %s77_s0  ;;  %p83_p7 = scmp.lt.s32.totalorder %s77_s0, %s77_s0 }
  0x12   :  { %v24_v3 = vmul.f32 1.442695, %v23_v2  ;;  %p84_p8 = por %p83_p7, %p82_p6 }
  0x14   :  { %53 = vpow2.f32 %v24_v3  ;;  %p85_p9 = pnand %p84_p8, %p78_p5 }
  0x21   :  { %v54_v4 = vpop.eup %53 }
  0x22   :  { %v28_v5 = vadd.f32 1.0, %v54_v4  ;;  %v27_v7 = vsel %vm26_vm0, 1.0, %v54_v4 }
  0x24   :  { %55 = vrcp.f32 %v28_v5 }
  0x31   :  { %v56_v8 = vpop.eup %55 }
  0x32   :  { %v30_v9 = vmul.f32 %v56_v8, %v27_v7 }
  0x34   :  { %35 = vst.msk [vmem:[#allocation5] sm:$0x3] %vm33_vm1, %v30_v9 }
  0x35   :  { %88 = shalt.err (!%p85_p9)
}
  0x36   :  { %45 = dma.vmem_to_hbm [thread:$0]  %s43_s12, 32, %s120_s1, [#allocation4]  }
  0x37   :  { %99 = dma.done.wait [#allocation4], 32  }
  0x38   :  { %100 = vsyncadd [#allocation4], 4294967264 }
  0x39   :  { %49 = vsyncpa [#allocation3], 1 }
  0x3a   :  { %50 = vsyncpa [#allocation4], 1 }

</bundles_post_ra>
